<compile_context>
chip_gen: v7x
topology: tpu7x:2x2x1
jax: 0.10.0
libtpu: 0.0.40
codegen_flags: <defaults>
</compile_context>

<pallas_src>
import functools

import numpy as np
import jax
import jax.numpy as jnp
from jax.experimental import pallas as pl
from jax.experimental.pallas import tpu as pltpu


# ---------------------------------------------------------------------------
# Fused kernel: one grid step == one batch element.
#   x_ref    : (n, dim)
#   wqkv_ref : (dim, 3*inner)        (qkv.weight^T, bias-less)
#   wout_ref : (inner, dim)          (out[0].weight^T)
#   bout_ref : (1, dim)              (out[0].bias)
#   bias_ref : (inner, inner)        additive mask bias (0 keep / -1e30 drop)
#   o_ref    : (n, dim)
# ---------------------------------------------------------------------------
def _fused_attention_kernel(x_ref, wqkv_ref, wout_ref, bout_ref, bias_ref, o_ref, *,
                            n, dim, inner):
    g = inner // n                         # n-wide column blocks per q/k/v chunk
    scale = 1.0 / (float(n) ** 0.5)        # torch: attn / q.shape[-1]**0.5, q.shape[-1] == n

    x = x_ref[...]                         # (n, dim) -- MXU operand in its native dtype

    # --- qkv projection, emitted directly in the "reshaped" layout ------------
    # Row (m*n + a) of *_cat is row (a*g + m) of the torch-reshaped (heads*hd, n)
    # tensor (head = a // p, within-head row = (a % p)*g + m, with p = n // heads).
    def proj_cat(col0):
        blocks = [
            jnp.dot(x, wqkv_ref[:, col0 + m * n: col0 + (m + 1) * n],
                    preferred_element_type=jnp.float32)
            for m in range(g)
        ]
        return jnp.concatenate(blocks, axis=0)        # (inner, n), f32

    q_cat = proj_cat(0)
    k_cat = proj_cat(inner)
    v_cat = proj_cat(2 * inner)

    # --- scores for every head at once (inner x inner); contract the shared
    # n axis of q and k directly (no transpose of k).
    s = jax.lax.dot_general(
        q_cat, k_cat, (((1,), (1,)), ((), ())),
        preferred_element_type=jnp.float32) * scale

    # Per-head softmax == block-diagonal masked softmax on the big score matrix.
    # The (constant) mask is a host-precomputed additive bias: 0 keep, -1e30 drop.
    s = s + bias_ref[...]
    m_ = jnp.max(s, axis=-1, keepdims=True)
    e = jnp.exp(s - m_)
    probs = e * pl.reciprocal(jnp.sum(e, axis=-1, keepdims=True), approx=True)

    # --- probs @ v for every head at once; masked entries are exactly zero so
    # cross-head contributions vanish.
    out_cat = jnp.dot(probs, v_cat, preferred_element_type=jnp.float32)   # (inner, n)

    # --- output projection.  out_cat[c*n + i, t] is element (i, c*n + t) of the
    # torch-merged (n, inner) tensor, so  y = bias + sum_c out_cat[c-blk] @ w_out[c-blk].
    y = bout_ref[...].astype(jnp.float32)             # (1, dim), broadcasts over rows
    for c in range(g):
        y = y + jnp.dot(out_cat[c * n:(c + 1) * n, :],
                        wout_ref[c * n:(c + 1) * n, :],
                        preferred_element_type=jnp.float32)
    # TODO(synk): nn.Dropout after the Linear is stochastic in training mode;
    # treated as identity here (inference / p == 0).
    o_ref[...] = y.astype(o_ref.dtype)


# ---------------------------------------------------------------------------
# Host-side constant: block-diagonal (same-head) additive mask bias in the
# "cat" layout used by the kernel; optionally also the torch triu causal mask.
# ---------------------------------------------------------------------------
def _mask_bias(n, inner, heads, causal):
    g = inner // n
    p = n // heads
    row = np.arange(inner)[:, None]
    col = np.arange(inner)[None, :]
    keep = ((row % n) // p) == ((col % n) // p)       # same head
    if causal:                                        # optional torch `mask(attn)` path
        d1 = ((row % n) % p) * g + row // n
        d2 = ((col % n) % p) * g + col // n
        keep = np.logical_and(keep, d2 <= d1)
    return jnp.asarray(np.where(keep, 0.0, -1e30).astype(np.float32))


# ---------------------------------------------------------------------------
# Wrapper: single fused pallas_call, grid over batch.
# ---------------------------------------------------------------------------
def attention_forward(x, w_qkv, w_out, b_out, heads, causal=False):
    b, n, dim = x.shape
    three_inner = w_qkv.shape[1]
    inner = three_inner // 3
    assert inner * 3 == three_inner and inner % heads == 0
    # TODO(synk): the fused no-reshape layout needs inner % n == 0 and
    # n % heads == 0; other shapes would need an unfused fallback path.
    assert inner % n == 0 and n % heads == 0, "unsupported (n, inner, heads) combo"

    bias = _mask_bias(n, inner, heads, causal)

    kernel = functools.partial(
        _fused_attention_kernel, n=n, dim=dim, inner=inner)

    return pl.pallas_call(
        kernel,
        grid=(b,),
        in_specs=[
            pl.BlockSpec((None, n, dim), lambda i: (i, 0, 0)),      # x[i]  (batch squeezed)
            pl.BlockSpec((dim, three_inner), lambda i: (0, 0)),     # w_qkv (VMEM-resident)
            pl.BlockSpec((inner, dim), lambda i: (0, 0)),           # w_out (VMEM-resident)
            pl.BlockSpec((1, dim), lambda i: (0, 0)),               # b_out
            pl.BlockSpec((inner, inner), lambda i: (0, 0)),         # mask bias (constant)
        ],
        out_specs=pl.BlockSpec((None, n, dim), lambda i: (i, 0, 0)),
        out_shape=jax.ShapeDtypeStruct((b, n, dim), x.dtype),
        compiler_params=pltpu.CompilerParams(
            dimension_semantics=("parallel",)),
    )(x, w_qkv, w_out, b_out.reshape(1, dim), bias)


# ---------------------------------------------------------------------------
# Pure-JAX reference (mirrors the torch module exactly) -- verification only.
# ---------------------------------------------------------------------------
def _reference(x, w_qkv, w_out, b_out, heads):
    b, n, dim = x.shape
    inner = w_qkv.shape[1] // 3
    hd = inner // heads
    qkv = x @ w_qkv
    q_l, k_l, v_l = jnp.split(qkv, 3, axis=-1)
    q = q_l.reshape(b, heads, hd, n)
    k = k_l.reshape(b, heads, hd, n)
    v = v_l.reshape(b, heads, hd, n)
    attn = jnp.einsum("bhdn,bhen->bhde", q, k) / jnp.sqrt(jnp.float32(n))
    p = jax.nn.softmax(attn, axis=-1)
    out = jnp.einsum("bhde,bhen->bhdn", p, v).reshape(b, n, inner)
    return out @ w_out + b_out


if __name__ == "__main__":
    # Attention(dim=32, head_dim=8, heads=4, dropout=0.0); x: (2, 8, 32)
    b, n, dim, heads, head_dim = 2, 8, 32, 4, 8
    inner = heads * head_dim

    key = jax.random.PRNGKey(0)
    k1, k2, k3, k4 = jax.random.split(key, 4)
    x = jax.random.normal(k1, (b, n, dim), jnp.float32)
    w_qkv = jax.random.normal(k2, (dim, 3 * inner), jnp.float32) * 0.1   # qkv.weight^T
    w_out = jax.random.normal(k3, (inner, dim), jnp.float32) * 0.1       # out[0].weight^T
    b_out = jax.random.normal(k4, (dim,), jnp.float32) * 0.1             # out[0].bias

    y = attention_forward(x, w_qkv, w_out, b_out, heads)
    jax.block_until_ready(y)

    ref = _reference(x, w_qkv, w_out, b_out, heads)
    err = float(jnp.max(jnp.abs(y - ref)))
    # slightly loose tolerance: softmax denominator uses the EUP approx reciprocal
    if err > 5e-3:
        raise AssertionError(f"Pallas kernel mismatch vs reference, max abs err = {err}")

    print("KERNEL_OK")
</pallas_src>

<mosaic_0001>
module attributes {stable_mosaic.version = 11 : i64} {
  func.func @_fused_attention_kernel(%arg0: i32, %arg1: memref<1x8x32xf32, #tpu.memory_space<vmem>>, %arg2: memref<32x96xf32, #tpu.memory_space<vmem>>, %arg3: memref<32x32xf32, #tpu.memory_space<vmem>>, %arg4: memref<1x32xf32, #tpu.memory_space<vmem>>, %arg5: memref<32x32xf32, #tpu.memory_space<vmem>>, %arg6: memref<1x8x32xf32, #tpu.memory_space<vmem>>) attributes {dimension_semantics = [#tpu.dimension_semantics<parallel>], iteration_bounds = array<i64: 2>, scalar_prefetch = 0 : i64, scratch_operands = 0 : i64, tpu.core_type = #tpu.core_type<tc>, window_params = [{transform_indices = @transform_0, window_bounds = array<i64: 1, 8, 32>}, {pipeline_mode = #tpu.pipeline_mode<synchronous>, transform_indices = @transform_1, window_bounds = array<i64: 32, 96>}, {pipeline_mode = #tpu.pipeline_mode<synchronous>, transform_indices = @transform_2, window_bounds = array<i64: 32, 32>}, {pipeline_mode = #tpu.pipeline_mode<synchronous>, transform_indices = @transform_3, window_bounds = array<i64: 1, 32>}, {pipeline_mode = #tpu.pipeline_mode<synchronous>, transform_indices = @transform_4, window_bounds = array<i64: 32, 32>}, {transform_indices = @transform_5, window_bounds = array<i64: 1, 8, 32>}]} {
    %c0 = arith.constant 0 : index
    %c0_0 = arith.constant 0 : index
    %c0_1 = arith.constant 0 : index
    %0 = vector.load %arg1[%c0, %c0_0, %c0_1] : memref<1x8x32xf32, #tpu.memory_space<vmem>>, vector<1x8x32xf32>
    %1 = vector.shape_cast %0 : vector<1x8x32xf32> to vector<8x32xf32>
    %c0_2 = arith.constant 0 : index
    %c0_3 = arith.constant 0 : index
    %2 = vector.load %arg2[%c0_2, %c0_3] : memref<32x96xf32, #tpu.memory_space<vmem>>, vector<32x8xf32>
    %cst = arith.constant dense<0.000000e+00> : vector<8x8xf32>
    %3 = tpu.matmul %1, %2, %cst {dimension_numbers = #tpu.dot_dimension_numbers<[1], [0], [0], [1], [0, 0, 1, 1], [], []>} : vector<8x32xf32>, vector<32x8xf32>, vector<8x8xf32> -> vector<8x8xf32>
    %c0_4 = arith.constant 0 : index
    %c8 = arith.constant 8 : index
    %4 = vector.load %arg2[%c0_4, %c8] : memref<32x96xf32, #tpu.memory_space<vmem>>, vector<32x8xf32>
    %cst_5 = arith.constant dense<0.000000e+00> : vector<8x8xf32>
    %5 = tpu.matmul %1, %4, %cst_5 {dimension_numbers = #tpu.dot_dimension_numbers<[1], [0], [0], [1], [0, 0, 1, 1], [], []>} : vector<8x32xf32>, vector<32x8xf32>, vector<8x8xf32> -> vector<8x8xf32>
    %c0_6 = arith.constant 0 : index
    %c16 = arith.constant 16 : index
    %6 = vector.load %arg2[%c0_6, %c16] : memref<32x96xf32, #tpu.memory_space<vmem>>, vector<32x8xf32>
    %cst_7 = arith.constant dense<0.000000e+00> : vector<8x8xf32>
    %7 = tpu.matmul %1, %6, %cst_7 {dimension_numbers = #tpu.dot_dimension_numbers<[1], [0], [0], [1], [0, 0, 1, 1], [], []>} : vector<8x32xf32>, vector<32x8xf32>, vector<8x8xf32> -> vector<8x8xf32>
    %c0_8 = arith.constant 0 : index
    %c24 = arith.constant 24 : index
    %8 = vector.load %arg2[%c0_8, %c24] : memref<32x96xf32, #tpu.memory_space<vmem>>, vector<32x8xf32>
    %cst_9 = arith.constant dense<0.000000e+00> : vector<8x8xf32>
    %9 = tpu.matmul %1, %8, %cst_9 {dimension_numbers = #tpu.dot_dimension_numbers<[1], [0], [0], [1], [0, 0, 1, 1], [], []>} : vector<8x32xf32>, vector<32x8xf32>, vector<8x8xf32> -> vector<8x8xf32>
    %10 = tpu.concatenate %3, %5, %7, %9 in 0 : vector<8x8xf32>, vector<8x8xf32>, vector<8x8xf32>, vector<8x8xf32> -> vector<32x8xf32>
    %c0_10 = arith.constant 0 : index
    %c32 = arith.constant 32 : index
    %11 = vector.load %arg2[%c0_10, %c32] : memref<32x96xf32, #tpu.memory_space<vmem>>, vector<32x8xf32>
    %cst_11 = arith.constant dense<0.000000e+00> : vector<8x8xf32>
    %12 = tpu.matmul %1, %11, %cst_11 {dimension_numbers = #tpu.dot_dimension_numbers<[1], [0], [0], [1], [0, 0, 1, 1], [], []>} : vector<8x32xf32>, vector<32x8xf32>, vector<8x8xf32> -> vector<8x8xf32>
    %c0_12 = arith.constant 0 : index
    %c40 = arith.constant 40 : index
    %13 = vector.load %arg2[%c0_12, %c40] : memref<32x96xf32, #tpu.memory_space<vmem>>, vector<32x8xf32>
    %cst_13 = arith.constant dense<0.000000e+00> : vector<8x8xf32>
    %14 = tpu.matmul %1, %13, %cst_13 {dimension_numbers = #tpu.dot_dimension_numbers<[1], [0], [0], [1], [0, 0, 1, 1], [], []>} : vector<8x32xf32>, vector<32x8xf32>, vector<8x8xf32> -> vector<8x8xf32>
    %c0_14 = arith.constant 0 : index
    %c48 = arith.constant 48 : index
    %15 = vector.load %arg2[%c0_14, %c48] : memref<32x96xf32, #tpu.memory_space<vmem>>, vector<32x8xf32>
    %cst_15 = arith.constant dense<0.000000e+00> : vector<8x8xf32>
    %16 = tpu.matmul %1, %15, %cst_15 {dimension_numbers = #tpu.dot_dimension_numbers<[1], [0], [0], [1], [0, 0, 1, 1], [], []>} : vector<8x32xf32>, vector<32x8xf32>, vector<8x8xf32> -> vector<8x8xf32>
    %c0_16 = arith.constant 0 : index
    %c56 = arith.constant 56 : index
    %17 = vector.load %arg2[%c0_16, %c56] : memref<32x96xf32, #tpu.memory_space<vmem>>, vector<32x8xf32>
    %cst_17 = arith.constant dense<0.000000e+00> : vector<8x8xf32>
    %18 = tpu.matmul %1, %17, %cst_17 {dimension_numbers = #tpu.dot_dimension_numbers<[1], [0], [0], [1], [0, 0, 1, 1], [], []>} : vector<8x32xf32>, vector<32x8xf32>, vector<8x8xf32> -> vector<8x8xf32>
    %19 = tpu.concatenate %12, %14, %16, %18 in 0 : vector<8x8xf32>, vector<8x8xf32>, vector<8x8xf32>, vector<8x8xf32> -> vector<32x8xf32>
    %c0_18 = arith.constant 0 : index
    %c64 = arith.constant 64 : index
    %20 = vector.load %arg2[%c0_18, %c64] : memref<32x96xf32, #tpu.memory_space<vmem>>, vector<32x8xf32>
    %cst_19 = arith.constant dense<0.000000e+00> : vector<8x8xf32>
    %21 = tpu.matmul %1, %20, %cst_19 {dimension_numbers = #tpu.dot_dimension_numbers<[1], [0], [0], [1], [0, 0, 1, 1], [], []>} : vector<8x32xf32>, vector<32x8xf32>, vector<8x8xf32> -> vector<8x8xf32>
    %c0_20 = arith.constant 0 : index
    %c72 = arith.constant 72 : index
    %22 = vector.load %arg2[%c0_20, %c72] : memref<32x96xf32, #tpu.memory_space<vmem>>, vector<32x8xf32>
    %cst_21 = arith.constant dense<0.000000e+00> : vector<8x8xf32>
    %23 = tpu.matmul %1, %22, %cst_21 {dimension_numbers = #tpu.dot_dimension_numbers<[1], [0], [0], [1], [0, 0, 1, 1], [], []>} : vector<8x32xf32>, vector<32x8xf32>, vector<8x8xf32> -> vector<8x8xf32>
    %c0_22 = arith.constant 0 : index
    %c80 = arith.constant 80 : index
    %24 = vector.load %arg2[%c0_22, %c80] : memref<32x96xf32, #tpu.memory_space<vmem>>, vector<32x8xf32>
    %cst_23 = arith.constant dense<0.000000e+00> : vector<8x8xf32>
    %25 = tpu.matmul %1, %24, %cst_23 {dimension_numbers = #tpu.dot_dimension_numbers<[1], [0], [0], [1], [0, 0, 1, 1], [], []>} : vector<8x32xf32>, vector<32x8xf32>, vector<8x8xf32> -> vector<8x8xf32>
    %c0_24 = arith.constant 0 : index
    %c88 = arith.constant 88 : index
    %26 = vector.load %arg2[%c0_24, %c88] : memref<32x96xf32, #tpu.memory_space<vmem>>, vector<32x8xf32>
    %cst_25 = arith.constant dense<0.000000e+00> : vector<8x8xf32>
    %27 = tpu.matmul %1, %26, %cst_25 {dimension_numbers = #tpu.dot_dimension_numbers<[1], [0], [0], [1], [0, 0, 1, 1], [], []>} : vector<8x32xf32>, vector<32x8xf32>, vector<8x8xf32> -> vector<8x8xf32>
    %28 = tpu.concatenate %21, %23, %25, %27 in 0 : vector<8x8xf32>, vector<8x8xf32>, vector<8x8xf32>, vector<8x8xf32> -> vector<32x8xf32>
    %cst_26 = arith.constant dense<0.000000e+00> : vector<32x32xf32>
    %29 = tpu.matmul %10, %19, %cst_26 {dimension_numbers = #tpu.dot_dimension_numbers<[1], [1], [0], [0], [0, 0, 1, 0], [], []>} : vector<32x8xf32>, vector<32x8xf32>, vector<32x32xf32> -> vector<32x32xf32>
    %cst_27 = arith.constant 0.353553385 : f32
    %30 = vector.broadcast %cst_27 : f32 to vector<32x32xf32>
    %31 = arith.mulf %29, %30 : vector<32x32xf32>
    %c0_28 = arith.constant 0 : index
    %c0_29 = arith.constant 0 : index
    %32 = vector.load %arg5[%c0_28, %c0_29] : memref<32x32xf32, #tpu.memory_space<vmem>>, vector<32x32xf32>
    %33 = arith.addf %31, %32 : vector<32x32xf32>
    %cst_30 = arith.constant dense<0xFF800000> : vector<32xf32>
    %34 = vector.multi_reduction <maximumf>, %33, %cst_30 [1] : vector<32x32xf32> to vector<32xf32>
    %35 = vector.shape_cast %34 : vector<32xf32> to vector<32x1xf32>
    %36 = vector.broadcast %35 : vector<32x1xf32> to vector<32x32xf32>
    %37 = arith.subf %33, %36 : vector<32x32xf32>
    %38 = math.exp %37 : vector<32x32xf32>
    %cst_31 = arith.constant dense<0.000000e+00> : vector<32xf32>
    %39 = vector.multi_reduction <add>, %38, %cst_31 [1] : vector<32x32xf32> to vector<32xf32>
    %40 = vector.shape_cast %39 : vector<32xf32> to vector<32x1xf32>
    %41 = tpu.reciprocal %40 {approx = true} : vector<32x1xf32> -> vector<32x1xf32>
    %42 = vector.broadcast %41 : vector<32x1xf32> to vector<32x32xf32>
    %43 = arith.mulf %38, %42 : vector<32x32xf32>
    %cst_32 = arith.constant dense<0.000000e+00> : vector<32x8xf32>
    %44 = tpu.matmul %43, %28, %cst_32 {dimension_numbers = #tpu.dot_dimension_numbers<[1], [0], [0], [1], [0, 0, 1, 1], [], []>} : vector<32x32xf32>, vector<32x8xf32>, vector<32x8xf32> -> vector<32x8xf32>
    %c0_33 = arith.constant 0 : index
    %c0_34 = arith.constant 0 : index
    %45 = vector.load %arg4[%c0_33, %c0_34] : memref<1x32xf32, #tpu.memory_space<vmem>>, vector<1x32xf32>
    %46 = vector.extract_strided_slice %44 {offsets = [0, 0], sizes = [8, 8], strides = [1, 1]} : vector<32x8xf32> to vector<8x8xf32>
    %c0_35 = arith.constant 0 : index
    %c0_36 = arith.constant 0 : index
    %47 = vector.load %arg3[%c0_35, %c0_36] : memref<32x32xf32, #tpu.memory_space<vmem>>, vector<8x32xf32>
    %cst_37 = arith.constant dense<0.000000e+00> : vector<8x32xf32>
    %48 = tpu.matmul %46, %47, %cst_37 {dimension_numbers = #tpu.dot_dimension_numbers<[1], [0], [0], [1], [0, 0, 1, 1], [], []>} : vector<8x8xf32>, vector<8x32xf32>, vector<8x32xf32> -> vector<8x32xf32>
    %49 = vector.broadcast %45 : vector<1x32xf32> to vector<8x32xf32>
    %50 = arith.addf %49, %48 : vector<8x32xf32>
    %51 = vector.extract_strided_slice %44 {offsets = [8, 0], sizes = [8, 8], strides = [1, 1]} : vector<32x8xf32> to vector<8x8xf32>
    %c8_38 = arith.constant 8 : index
    %c0_39 = arith.constant 0 : index
    %52 = vector.load %arg3[%c8_38, %c0_39] : memref<32x32xf32, #tpu.memory_space<vmem>>, vector<8x32xf32>
    %cst_40 = arith.constant dense<0.000000e+00> : vector<8x32xf32>
    %53 = tpu.matmul %51, %52, %cst_40 {dimension_numbers = #tpu.dot_dimension_numbers<[1], [0], [0], [1], [0, 0, 1, 1], [], []>} : vector<8x8xf32>, vector<8x32xf32>, vector<8x32xf32> -> vector<8x32xf32>
    %54 = arith.addf %50, %53 : vector<8x32xf32>
    %55 = vector.extract_strided_slice %44 {offsets = [16, 0], sizes = [8, 8], strides = [1, 1]} : vector<32x8xf32> to vector<8x8xf32>
    %c16_41 = arith.constant 16 : index
    %c0_42 = arith.constant 0 : index
    %56 = vector.load %arg3[%c16_41, %c0_42] : memref<32x32xf32, #tpu.memory_space<vmem>>, vector<8x32xf32>
    %cst_43 = arith.constant dense<0.000000e+00> : vector<8x32xf32>
    %57 = tpu.matmul %55, %56, %cst_43 {dimension_numbers = #tpu.dot_dimension_numbers<[1], [0], [0], [1], [0, 0, 1, 1], [], []>} : vector<8x8xf32>, vector<8x32xf32>, vector<8x32xf32> -> vector<8x32xf32>
    %58 = arith.addf %54, %57 : vector<8x32xf32>
    %59 = vector.extract_strided_slice %44 {offsets = [24, 0], sizes = [8, 8], strides = [1, 1]} : vector<32x8xf32> to vector<8x8xf32>
    %c24_44 = arith.constant 24 : index
    %c0_45 = arith.constant 0 : index
    %60 = vector.load %arg3[%c24_44, %c0_45] : memref<32x32xf32, #tpu.memory_space<vmem>>, vector<8x32xf32>
    %cst_46 = arith.constant dense<0.000000e+00> : vector<8x32xf32>
    %61 = tpu.matmul %59, %60, %cst_46 {dimension_numbers = #tpu.dot_dimension_numbers<[1], [0], [0], [1], [0, 0, 1, 1], [], []>} : vector<8x8xf32>, vector<8x32xf32>, vector<8x32xf32> -> vector<8x32xf32>
    %62 = arith.addf %58, %61 : vector<8x32xf32>
    %c0_47 = arith.constant 0 : index
    %c0_48 = arith.constant 0 : index
    %c0_49 = arith.constant 0 : index
    %63 = vector.load %arg6[%c0_47, %c0_48, %c0_49] : memref<1x8x32xf32, #tpu.memory_space<vmem>>, vector<1x8x32xf32>
    %64 = vector.shape_cast %63 : vector<1x8x32xf32> to vector<8x32xf32>
    %65 = vector.shape_cast %62 : vector<8x32xf32> to vector<1x8x32xf32>
    tpu.vector_store %arg6[%c0_47, %c0_48, %c0_49], %65 {strides = array<i32>} : memref<1x8x32xf32, #tpu.memory_space<vmem>>, vector<1x8x32xf32>,
    return
  }
  func.func @transform_0(%arg0: i32) -> (i32, i32, i32) {
    %c0_i32 = arith.constant 0 : i32
    %c0_i32_0 = arith.constant 0 : i32
    %c0_i32_1 = arith.constant 0 : i32
    return %arg0, %c0_i32, %c0_i32_0 : i32, i32, i32
  }
  func.func @transform_1(%arg0: i32) -> (i32, i32) {
    %c0_i32 = arith.constant 0 : i32
    %c0_i32_0 = arith.constant 0 : i32
    %c0_i32_1 = arith.constant 0 : i32
    return %c0_i32, %c0_i32_0 : i32, i32
  }
  func.func @transform_2(%arg0: i32) -> (i32, i32) {
    %c0_i32 = arith.constant 0 : i32
    %c0_i32_0 = arith.constant 0 : i32
    %c0_i32_1 = arith.constant 0 : i32
    return %c0_i32, %c0_i32_0 : i32, i32
  }
  func.func @transform_3(%arg0: i32) -> (i32, i32) {
    %c0_i32 = arith.constant 0 : i32
    %c0_i32_0 = arith.constant 0 : i32
    %c0_i32_1 = arith.constant 0 : i32
    return %c0_i32, %c0_i32_0 : i32, i32
  }
  func.func @transform_4(%arg0: i32) -> (i32, i32) {
    %c0_i32 = arith.constant 0 : i32
    %c0_i32_0 = arith.constant 0 : i32
    %c0_i32_1 = arith.constant 0 : i32
    return %c0_i32, %c0_i32_0 : i32, i32
  }
  func.func @transform_5(%arg0: i32) -> (i32, i32, i32) {
    %c0_i32 = arith.constant 0 : i32
    %c0_i32_0 = arith.constant 0 : i32
    %c0_i32_1 = arith.constant 0 : i32
    return %arg0, %c0_i32, %c0_i32_0 : i32, i32, i32
  }
}

</mosaic_0001>

<bundles_post_ra>
// kernel: tpu_custom_call.1
= control target key start
LH: loop header
LB: loop body
LE: loop exit
PB: predicated region body
PF: predicated region fallthrough
CT: control target
= control target key end

     0   :  { %10 = vsyncpa [#allocation3], 0  ;;  %s3209_s0 = inlined_call_operand.hbm [shape: f32[2,8,32], index: 0, kind: input, shape index: {}]   ;;  %s3210_s1 = inlined_call_operand.hbm [shape: f32[32,96], index: 1, kind: input, shape index: {}]   ;;  %s3211_s2 = inlined_call_operand.hbm [shape: f32[32,32], index: 2, kind: input, shape index: {}]   ;;  %s3212_s3 = inlined_call_operand.vmem [shape: f32[1,32], index: 3, kind: input, shape index: {}]   ;;  %s3213_s4 = inlined_call_operand.hbm [shape: f32[32,32], index: 4, kind: input, shape index: {}]   ;;  %s3214_s5 = inlined_call_operand.hbm [shape: f32[2,8,32], index: 5, kind: output, shape index: {}]  }
   0x1   :  { %12 = vsyncpa [#allocation3 + $0x1], 0 }
   0x2   :  { %13 = vsyncpa [#allocation6], 0 }
   0x3   :  { %14 = vsyncpa [#allocation9], 0 }
   0x4   :  { %15 = vsyncpa [#allocation4], 0 }
   0x5   :  { %17 = vsyncpa [#allocation4 + $0x1], 0  ;;  %s2827_s18 = smov 0   ;;  %s2829_s19 = smov 0  }
   0x6   :  { %s2831_s20 = smov 0   ;;  %s2833_s21 = smov 0  }
   0x7 LB: > { %s2848_s22 = sadd.s32 4294967295, %s2774_s21   ;;  %s1953_s23 = sadd.s32 4294967294, %s2774_s21   ;;  %s2774_s21 = sphi %s2833_s21, %s3237_s21   ;;  %s2770_s20 = sphi %s2831_s20, %s3236_s20   ;;  %s2766_s19 = sphi %s2829_s19, %s3235_s19   ;;  %s2762_s18 = sphi %s2827_s18, %s3234_s18  }
   0x8   : > { %p43_p0 = scmp.ne.s32.totalorder %s2766_s19, %s2762_s18  ;;  %p3215_p1 = scmp.eq.s32.totalorder %s2848_s22, 0 }
   0x9   : > { %p157_p3 = scmp.eq.s32.totalorder %s1953_s23, 1  ;;  %p1954_p5 = scmp.ge.s32.totalorder %s2774_s21, 1 }
   0xa   : > { %p2857_p4 = por %p3215_p1, %p43_p0  ;;  %p164_p7 = scmp.lt.s32.totalorder %s2774_s21, 3 }
   0xb   : > { %p2862_p6 = por %p157_p3, %p43_p0  ;;  %s2776_s27 = smov [#allocation5]  }
   0xc   : > { %s3218_s24 = scalar_select %p2857_p4, 1, 0 }
   0xd   : > { %s3219_s25 = scalar_select %p2862_p6, 1, 0 }
   0xe   : > { %p2867_p8 = pnand %p1954_p5, %p164_p7  ;;  %s176_s28 = sshll.u32 %s2776_s27, 4  ;;  %s2871_s28 = int_to_ptr.vmem [resolvable:$true] %s176_s28 }
   0xf   : > { %s2777_s30 = smov [#allocation7]   ;;  %s2778_s7 = smov [#allocation8]  }
  0x10   : > { %s3220_s26 = scalar_select %p2867_p8, 1, 0 }
  0x11   : > { %p2383_p9 = pneg %p2867_p8  ;;  %s189_s6 = sshll.u32 %s2777_s30, 4  ;;  %s2882_s6 = int_to_ptr.vmem [resolvable:$true] %s189_s6 }
  0x12   : > { %s2884_s8 = sshll.u32 %s2778_s7, 4  ;;  %s2586_s11 = scalar_lea.hbm %s3210_s1, 512  ;;  %s206_s8 = int_to_ptr.vmem [resolvable:$true] %s2884_s8 }
  0x13   : > { %p2878_p11 = pnand %p2383_p9, %p3215_p1  ;;  %p2587_p12 = scmp.ne.s32.totalorder %s3210_s1, %s2586_s11 }
  0x14   : > { %p2593_p5 = scmp.lt.u32.totalorder %s2586_s11, %s3210_s1 }
  0x15   : > { %p2894_p13 = pneg %p2878_p11 }
  0x17   : > { %p2589_p0 = pnand %p2894_p13, %p2587_p12 }
  0x19   : > { %p2590_p3 = pneg %p2589_p0 }
  0x1b   : > { %p2595_p7 = pnand %p2593_p5, %p2590_p3 }
  0x1d   : > { %2598 = shalt.err (!%p2595_p7)
}
  0x1e   : > { %s2599_s17 = scalar_lea.vmem %s2871_s28, 512  ;;  %p2607_p2 = scmp.lt.s32.totalorder %s2871_s28, %s2871_s28 }
  0x1f   : > { %p2600_p9 = scmp.ne.s32.totalorder %s2871_s28, %s2599_s17  ;;  %p2608_p6 = scmp.lt.s32.totalorder %s2599_s17, %s2599_s17 }
  0x21   : > { %p2602_p10 = pnand %p2600_p9, %p2894_p13  ;;  %p2609_p12 = por %p2608_p6, %p2607_p2 }
  0x23   : > { %p2603_p1 = pneg %p2602_p10 }
  0x25   : > { %p2610_p0 = pnand %p2609_p12, %p2603_p1 }
  0x27   : > { %2613 = shalt.err (!%p2610_p0)
}
  0x28   : > { %s2779_s23 = smov 128   ;;  %s2780_s27 = smov 8  }
  0x29   : > { %2386 = dma.hbm_to_vmem [thread:$0]  (!%p2878_p11), %s3210_s1, 512, %s2871_s28, [#allocation6], %s2779_s23, %s2779_s23, %s2780_s27  }
  0x2a   : > { %s2614_s11 = scalar_lea.hbm %s3211_s2, 512 }
  0x2b   : > { %p2615_p1 = scmp.ne.s32.totalorder %s3211_s2, %s2614_s11  ;;  %p2621_p10 = scmp.lt.u32.totalorder %s2614_s11, %s3211_s2 }
  0x2d   : > { %p2617_p2 = pnand %p2615_p1, %p2894_p13 }
  0x2f   : > { %p2618_p6 = pneg %p2617_p2 }
  0x31   : > { %p2623_p3 = pnand %p2621_p10, %p2618_p6 }
  0x33   : > { %2626 = shalt.err (!%p2623_p3)
}
  0x34   : > { %s2627_s28 = scalar_lea.vmem %s2882_s6, 512  ;;  %p2635_p12 = scmp.lt.s32.totalorder %s2882_s6, %s2882_s6 }
  0x35   : > { %p2628_p5 = scmp.ne.s32.totalorder %s2882_s6, %s2627_s28  ;;  %p2636_p0 = scmp.lt.s32.totalorder %s2627_s28, %s2627_s28 }
  0x37   : > { %p2630_p7 = pnand %p2628_p5, %p2894_p13  ;;  %p2637_p1 = por %p2636_p0, %p2635_p12 }
  0x39   : > { %p2631_p9 = pneg %p2630_p7 }
  0x3b   : > { %p2638_p2 = pnand %p2637_p1, %p2631_p9 }
  0x3d   : > { %2641 = shalt.err (!%p2638_p2)
}
  0x3e   : > { %2389 = dma.hbm_to_vmem [thread:$0]  (!%p2878_p11), %s3211_s2, 512, %s2882_s6, [#allocation6], %s2779_s23, %s2779_s23, %s2780_s27  }
  0x3f   : > { %s2642_s10 = scalar_lea.hbm %s3213_s4, 512 }
  0x40   : > { %p2643_p6 = scmp.ne.s32.totalorder %s3213_s4, %s2642_s10  ;;  %p2649_p5 = scmp.lt.u32.totalorder %s2642_s10, %s3213_s4 }
  0x42   : > { %p2645_p10 = pnand %p2643_p6, %p2894_p13 }
  0x44   : > { %p2646_p3 = pneg %p2645_p10 }
  0x46   : > { %p2651_p7 = pnand %p2649_p5, %p2646_p3 }
  0x48   : > { %2654 = shalt.err (!%p2651_p7)
}
  0x49   : > { %s2655_s16 = scalar_lea.vmem %s206_s8, 512  ;;  %p2663_p1 = scmp.lt.s32.totalorder %s206_s8, %s206_s8 }
  0x4a   : > { %p2656_p9 = scmp.ne.s32.totalorder %s206_s8, %s2655_s16  ;;  %p2664_p2 = scmp.lt.s32.totalorder %s2655_s16, %s2655_s16 }
  0x4c   : > { %p2658_p12 = pnand %p2656_p9, %p2894_p13  ;;  %p2665_p4 = por %p2664_p2, %p2663_p1 }
  0x4e   : > { %p2659_p0 = pneg %p2658_p12 }
  0x50   : > { %p2666_p8 = pnand %p2665_p4, %p2659_p0 }
  0x52   : > { %2669 = shalt.err (!%p2666_p8)
}
  0x53   : > { %2392 = dma.hbm_to_vmem [thread:$0]  (!%p2878_p11), %s3213_s4, 512, %s206_s8, [#allocation9], %s2779_s23, %s2779_s23, %s2780_s27  }
  0x54   : > { %s2967_s14 = sadd.s32 1, %s2774_s21   ;;  %s30_s17 = sadd.s32 1, %s2770_s20 }
  0x55   : > { %s27_s29 = ssub.s32 %s2774_s21, %s2967_s14  ;;  %p37_p8 = scmp.ne.s32.totalorder %s2770_s20, %s2766_s19 }
  0x56   : > { %p28_p4 = scmp.eq.s32.totalorder %s27_s29, 0  ;;  %p38_p13 = scmp.eq.s32.totalorder %s2774_s21, 0 }
  0x57   : > { %p2404_p6 = scmp.lt.s32.totalorder %s2774_s21, 2  ;;  %p3223_p3 = scmp.eq.s32.totalorder %s2848_s22, 1 }
  0x58   : > { %s2977_s30 = scalar_select %p28_p4, %s2770_s20, %s30_s17  }
  0x59   : > { %p39_p10 = por %p38_p13, %p37_p8  ;;  %p2981_p5 = por %p3223_p3, %p37_p8 }
  0x5a   : > { %s219_s9 = sand.u32 1, %s2770_s20   ;;  %s1960_s10 = sshll.u32 %s2774_s21, 7 }
  0x5b   : > { %s1959_s8 = sshll.u32 %s219_s9, 3  ;;  %s2990_s11 = scalar_lea.hbm %s3209_s0, %s1960_s10 }
  0x5c   : > { %s223_s12 = scalar_lea.vmem [#allocation2], %s1959_s8  ;;  %p2992_p11 = pnand %p2404_p6, %p39_p10 }
  0x5d   : > { %s230_s13 = sshll.u32 %s223_s12, 4  ;;  %s220_s16 = scalar_lea.sflag [#allocation3], %s219_s9  ;;  %s2996_s13 = int_to_ptr.vmem [resolvable:$true] %s230_s13 }
  0x5e   : > { %s2670_s6 = scalar_lea.hbm %s2990_s11, 128  ;;  %p2672_p9 = pneg %p2992_p11 }
  0x5f   : > { %p2671_p7 = scmp.ne.s32.totalorder %s2990_s11, %s2670_s6  ;;  %s2675_s17 = scalar_lea.hbm %s3209_s0, 256 }
  0x60   : > { %p2676_p1 = scmp.lt.u32.totalorder %s2990_s11, %s3209_s0  ;;  %p2677_p2 = scmp.lt.u32.totalorder %s2675_s17, %s2670_s6 }
  0x61   : > { %p2673_p12 = pnand %p2672_p9, %p2671_p7  ;;  %p2679_p8 = scmp.lt.u32.totalorder %s2670_s6, %s2990_s11 }
  0x62   : > { %p2678_p4 = por %p2677_p2, %p2676_p1 }
  0x63   : > { %p2674_p0 = pneg %p2673_p12 }
  0x64   : > { %p2680_p13 = por %p2679_p8, %p2678_p4 }
  0x66   : > { %p2681_p6 = pnand %p2680_p13, %p2674_p0 }
  0x68   : > { %2684 = shalt.err (!%p2681_p6)
}
  0x69   : > { %s2685_s9 = scalar_lea.vmem %s2996_s13, 128  ;;  %s2781_s23 = smov [#allocation2]  }
  0x6a   : > { %p2686_p10 = scmp.ne.s32.totalorder %s2996_s13, %s2685_s9  ;;  %s2690_s27 = sshll.u32 %s2781_s23, 4  ;;  %s2691_s27 = int_to_ptr.vmem [resolvable:$false] %s2690_s27 }
  0x6b   : > { %s2692_s12 = scalar_lea.vmem %s2691_s27, 256  ;;  %p2693_p12 = scmp.lt.s32.totalorder %s2996_s13, %s2691_s27 }
  0x6c   : > { %p2688_p3 = pnand %p2686_p10, %p2672_p9  ;;  %p2694_p1 = scmp.lt.s32.totalorder %s2692_s12, %s2685_s9 }
  0x6e   : > { %p2689_p7 = pneg %p2688_p3  ;;  %p2695_p2 = por %p2694_p1, %p2693_p12 }
  0x70   : > { %p2696_p4 = pnand %p2695_p2, %p2689_p7 }
  0x72   : > { %2699 = shalt.err (!%p2696_p4)
}
  0x73   : > { %2396 = dma.hbm_to_vmem [thread:$0]  (!%p2992_p11), %s2990_s11, 128, %s2996_s13, %s220_s16  }
  0x74   : > { %p3226_p0 = scmp.ne.s32.totalorder %s3220_s26, 0 }
  0x75   : > { %s3026_s6 = sand.u32 (!%p3226_p0), 1, %s2766_s19   ;;  %p3227_p9 = scmp.ne.s32.totalorder (!%p3226_p0), %s3218_s24, 0 }
  0x76   : > { %239 = sbr.rel (%p3226_p0) target bundleno = 1506 (0x5e2), region = 40  ;;  %s1962_s28 = sshll.u32 (!%p3226_p0), %s3026_s6, 3 }
  0x77   : > { %s242_s29 = scalar_lea.sflag (!%p3226_p0), [#allocation3], %s3026_s6  ;;  %s3032_s17 = scalar_lea.vmem (!%p3226_p0), [#allocation2], %s1962_s28 }
  0x7d   : > { %2745 = dma.done.wait (%p3227_p9), %s242_s29, 128  }
  0x7e   : > { %2747 = vsyncadd (%p3227_p9), %s242_s29, 4294967168  ;;  %p3228_p11 = scmp.eq.s32.totalorder %s2848_s22, 0 }
  0x80   : > { %2749 = dma.done.wait (%p3228_p11), [#allocation6], 1024   ;;  %p3229_p8 = pmov %p3228_p11 }
  0x82   : > { %2751 = vsyncadd (%p3229_p8), [#allocation6], 4294966272  ;;  %p3230_p13 = pmov %p3229_p8 }
  0x83   : > { %p3231_p6 = pmov %p3229_p8 }
  0x84   : > { %2753 = dma.done.wait (%p3230_p13), [#allocation9], 512  }
  0x85   : > { %2755 = vsyncadd (%p3231_p6), [#allocation9], 4294966784  ;;  %v2782_v0 = vmov 0.0|0.0   ;;  %vm2783_vm0 = vmmov 0   ;;  %v2784_v1 = vmov 0.0   ;;  %v285_v2 = vld [vmem:[#allocation5] sm:$0xff] }
  0x86   : > { %2264 = vmatprep.subr.bf16.mxu0 %v2782_v0  ;;  %2270 = vmatprep.subr.bf16.mxu1 %v2782_v0  ;;  %v286_v3 = vld [vmem:[#allocation5 + $0x8] sm:$0xff]  ;;  %v287_v4 = vld [vmem:[#allocation5 + $0x10] sm:$0xff]  ;;  %v288_v6 = vld [vmem:[#allocation5 + $0x18] sm:$0xff]  ;;  %s2785_s24 = smov 120   ;;  %s2786_s26 = smov 112   ;;  %vm289_vm1 = vcmask 261120  }
  0x87   : > { %2092 = vmatprep.mubr.msk.f32.mxu0 %vm2783_vm0, %v2784_v1  ;;  %2103 = vmatprep.mubr.msk.f32.mxu1 %vm2783_vm0, %v2784_v1  ;;  %v2460_v5 = vpack.i.bf16 %v286_v3, %v285_v2  ;;  %v2465_v7 = vpack.i.bf16 %v288_v6, %v287_v4  ;;  %v2265_v8 = vpack.c.bf16 %v286_v3, %v285_v2  ;;  %s2787_s11 = smov 104   ;;  %v3054_v10 = vld [vmem:[%s3032_s17] sm:$0xff]  ;;  %s2788_s13 = smov 96   ;;  %vm1269_vm2 = vcmask 64512  }
  0x88   : > { %v2268_v9 = vpack.c.bf16 %v288_v6, %v287_v4  ;;  %s2789_s15 = smov 88   ;;  %s2790_s16 = smov 80   ;;  %vm2337_vm3 = vmpackc.low %vm1269_vm2, %vm1269_vm2 }
  0x89   : > { %2461 = vrot.lane.b32.xlu0 %v2460_v5, %s2785_s24  ;;  %2471 = vrot.lane.b32.xlu1 %v2460_v5, %s2786_s26  ;;  %s2791_s10 = smov 72   ;;  %s2792_s8 = smov 64  }
  0x8a   : > { %2266 = vmatpush3.bf16.msra.mxu0 %v2265_v8  ;;  %s2793_s9 = smov 48   ;;  %s2794_s23 = smov 56  }
  0x8b   : > { %2267 = vmatprep.subr.bf16.mxu0 %v2782_v0  ;;  %s2795_s27 = smov 40   ;;  %s1997_s17 = sshll.u32 %s2848_s22, 7 }
  0x8d   : > { %2466 = vrot.lane.b32.xlu0 %v2465_v7, %s2785_s24  ;;  %2476 = vrot.lane.b32.xlu1 %v2460_v5, %s2787_s11  ;;  %s283_s24 = scalar_lea.vmem [#allocation10], %s1962_s28  ;;  %s2796_s28 = smov [#allocation10]  }
  0x8e   : > { %2269 = vmatpush3.bf16.msra.mxu0 %v2268_v9 }
  0x8f   : > { %2276 = vmatprep.subr.bf16.mxu0 %v2782_v0 }
  0x91   : > { %2481 = vrot.lane.b32.xlu0 %v2465_v7, %s2786_s26  ;;  %2486 = vrot.lane.b32.xlu1 %v2465_v7, %s2787_s11  ;;  %s1854_s26 = sshll.u32 %s283_s24, 4  ;;  %s3166_s26 = int_to_ptr.vmem [resolvable:$true] %s1854_s26 }
  0x92   : > { %2093 = vmatmul.mubr.msk.f32.vlgmr.msra.gmra.mrb[0].mxu0 %vm289_vm1, %v3054_v10  ;;  %s2700_s22 = scalar_lea.vmem %s3166_s26, 128 }
  0x93   : > { %2114 = vmatprep.mubr.msk.f32.mxu0 %vm2783_vm0, %v2784_v1  ;;  %p2701_p10 = scmp.ne.s32.totalorder %s3166_s26, %s2700_s22 }
  0x95   : > { %2491 = vrot.lane.b32.xlu0 %v2460_v5, %s2788_s13  ;;  %2496 = vrot.lane.b32.xlu1 %v2460_v5, %s2789_s15  ;;  %p2702_p3 = pnand %p2701_p10, %p2981_p5 }
  0x97   : > { %p2703_p7 = pneg %p2702_p3 }
  0x99   : > { %2501 = vrot.lane.b32.xlu0 %v2465_v7, %s2788_s13  ;;  %2506 = vrot.lane.b32.xlu1 %v2465_v7, %s2789_s15  ;;  %s3164_s15 = scalar_lea.hbm %s3214_s5, %s1997_s17 }
  0x9d   : > { %2511 = vrot.lane.b32.xlu0 %v2460_v5, %s2790_s16  ;;  %2516 = vrot.lane.b32.xlu1 %v2460_v5, %s2791_s10 }
  0xa1   : > { %2521 = vrot.lane.b32.xlu0 %v2465_v7, %s2790_s16  ;;  %2526 = vrot.lane.b32.xlu1 %v2465_v7, %s2791_s10  ;;  %s1841_s16 = scalar_lea.sflag [#allocation4], %s3026_s6  ;;  %s2704_s10 = sshll.u32 %s2796_s28, 4  ;;  %s2705_s10 = int_to_ptr.vmem [resolvable:$false] %s2704_s10 }
  0xa2   : > { %p2707_p12 = scmp.lt.s32.totalorder %s3166_s26, %s2705_s10 }
  0xa5   : > { %2531 = vrot.lane.b32.xlu0 %v2460_v5, %s2792_s8  ;;  %2536 = vrot.lane.b32.xlu1 %v2465_v7, %s2792_s8  ;;  %s2706_s8 = scalar_lea.vmem %s2705_s10, 256 }
  0xa6   : > { %p2708_p1 = scmp.lt.s32.totalorder %s2706_s8, %s2700_s22 }
  0xa8   : > { %p2709_p2 = por %p2708_p1, %p2707_p12 }
  0xa9   : > { %2541 = vrot.lane.b32.xlu0 %v2460_v5, %s2793_s9  ;;  %2546 = vrot.lane.b32.xlu1 %v2465_v7, %s2793_s9 }
  0xaa   : > { %p2710_p4 = pnand %p2709_p2, %p2703_p7 }
  0xad   : > { %2551 = vrot.lane.b32.xlu0 %v2460_v5, %s2794_s23  ;;  %2556 = vrot.lane.b32.xlu1 %v2465_v7, %s2794_s23 }
  0xb1   : > { %2561 = vrot.lane.b32.xlu0 %v2460_v5, %s2795_s27  ;;  %2566 = vrot.lane.b32.xlu1 %v2465_v7, %s2795_s27 }
  0xfb   : > { %v2462_v11 = vpop.permute.xlu0 %2461  ;;  %v2472_v12 = vpop.permute.xlu1 %2471 }
  0xfc   : > { %v2464_v13 = vunpack.i.h.bf16 %v2462_v11  ;;  %v2463_v14 = vunpack.i.l.bf16 %v2462_v11  ;;  %v2474_v15 = vunpack.i.h.bf16 %v2472_v12  ;;  %v2473_v16 = vunpack.i.l.bf16 %v2472_v12 }
  0xfe   : > { %v2277_v17 = vpack.c.bf16 %v2474_v15, %v2473_v16  ;;  %v2271_v18 = vpack.c.bf16 %v2464_v13, %v2463_v14 }
  0xff   : > { %v2467_v19 = vpop.permute.xlu0 %2466  ;;  %v2477_v20 = vpop.permute.xlu1 %2476 }
 0x100   : > { %v2469_v21 = vunpack.i.h.bf16 %v2467_v19  ;;  %v2468_v22 = vunpack.i.l.bf16 %v2467_v19  ;;  %2272 = vmatpush3.bf16.msra.mxu1 %v2271_v18  ;;  %v2479_v23 = vunpack.i.h.bf16 %v2477_v20  ;;  %v2478_v24 = vunpack.i.l.bf16 %v2477_v20  ;;  %2278 = vmatpush3.bf16.msra.mxu0 %v2277_v17 }
 0x101   : > { %2273 = vmatprep.subr.bf16.mxu1 %v2782_v0  ;;  %2279 = vmatprep.subr.bf16.mxu0 %v2782_v0 }
 0x102   : > { %v2274_v25 = vpack.c.bf16 %v2469_v21, %v2468_v22  ;;  %v2283_v26 = vpack.c.bf16 %v2479_v23, %v2478_v24 }
 0x103   : > { %v2482_v27 = vpop.permute.xlu0 %2481  ;;  %v2487_v28 = vpop.permute.xlu1 %2486 }
 0x104   : > { %2275 = vmatpush3.bf16.msra.mxu1 %v2274_v25  ;;  %v2484_v29 = vunpack.i.h.bf16 %v2482_v27  ;;  %v2483_v30 = vunpack.i.l.bf16 %v2482_v27  ;;  %v2489_v31 = vunpack.i.h.bf16 %v2487_v28  ;;  %v2488_v32 = vunpack.i.l.bf16 %v2487_v28 }
 0x105   : > { %2282 = vmatprep.subr.bf16.mxu1 %v2782_v0 }
 0x106   : > { %v2280_v33 = vpack.c.bf16 %v2484_v29, %v2483_v30  ;;  %v2286_v34 = vpack.c.bf16 %v2489_v31, %v2488_v32 }
 0x107   : > { %2104 = vmatmul.mubr.msk.f32.vlgmr.msra.gmra.mrb[0].mxu1 %vm289_vm1, %v3054_v10  ;;  %v2492_v35 = vpop.permute.xlu0 %2491  ;;  %v2497_v36 = vpop.permute.xlu1 %2496 }
 0x108   : > { %2284 = vmatpush3.bf16.msra.mxu1 %v2283_v26  ;;  %v2494_v37 = vunpack.i.h.bf16 %v2492_v35  ;;  %v2493_v38 = vunpack.i.l.bf16 %v2492_v35  ;;  %v2499_v39 = vunpack.i.h.bf16 %v2497_v36  ;;  %v2498_v40 = vunpack.i.l.bf16 %v2497_v36  ;;  %2281 = vmatpush3.bf16.msra.mxu0 %v2280_v33 }
 0x109   : > { %2285 = vmatprep.subr.bf16.mxu1 %v2782_v0  ;;  %2125 = vmatprep.mubr.msk.f32.mxu1 %vm2783_vm0, %v2784_v1 }
 0x10a   : > { %v2289_v41 = vpack.c.bf16 %v2494_v37, %v2493_v38  ;;  %2288 = vmatprep.subr.bf16.mxu0 %v2782_v0  ;;  %v2295_v42 = vpack.c.bf16 %v2499_v39, %v2498_v40 }
 0x10b   : > { %v2502_v43 = vpop.permute.xlu0 %2501  ;;  %v2507_v44 = vpop.permute.xlu1 %2506  ;;  %2115 = vmatmul.mubr.msk.f32.vlgmr.msra.gmra.mrb[2].mxu0 %vm289_vm1, %v3054_v10 }
 0x10c   : > { %2287 = vmatpush3.bf16.msra.mxu1 %v2286_v34  ;;  %v2504_v45 = vunpack.i.h.bf16 %v2502_v43  ;;  %v2503_v46 = vunpack.i.l.bf16 %v2502_v43  ;;  %v2509_v47 = vunpack.i.h.bf16 %v2507_v44  ;;  %v2508_v48 = vunpack.i.l.bf16 %v2507_v44  ;;  %2290 = vmatpush3.bf16.msra.mxu0 %v2289_v41 }
 0x10d   : > { %2294 = vmatprep.subr.bf16.mxu1 %v2782_v0  ;;  %2291 = vmatprep.subr.bf16.mxu0 %v2782_v0 }
 0x10e   : > { %v2292_v49 = vpack.c.bf16 %v2504_v45, %v2503_v46  ;;  %2136 = vmatprep.mubr.msk.f32.mxu0 %vm2783_vm0, %v2784_v1  ;;  %v2298_v50 = vpack.c.bf16 %v2509_v47, %v2508_v48 }
 0x10f   : > { %2126 = vmatmul.mubr.msk.f32.vlgmr.msra.gmra.mrb[2].mxu1 %vm289_vm1, %v3054_v10  ;;  %v2512_v51 = vpop.permute.xlu0 %2511  ;;  %v2517_v52 = vpop.permute.xlu1 %2516 }
 0x110   : > { %2296 = vmatpush3.bf16.msra.mxu1 %v2295_v42  ;;  %v2514_v53 = vunpack.i.h.bf16 %v2512_v51  ;;  %v2513_v54 = vunpack.i.l.bf16 %v2512_v51  ;;  %v2519_v55 = vunpack.i.h.bf16 %v2517_v52  ;;  %v2518_v56 = vunpack.i.l.bf16 %v2517_v52  ;;  %2293 = vmatpush3.bf16.msra.mxu0 %v2292_v49 }
 0x111   : > { %2297 = vmatprep.subr.bf16.mxu1 %v2782_v0  ;;  %2147 = vmatprep.mubr.msk.f32.mxu1 %vm2783_vm0, %v2784_v1 }
 0x112   : > { %v2301_v57 = vpack.c.bf16 %v2514_v53, %v2513_v54  ;;  %2300 = vmatprep.subr.bf16.mxu0 %v2782_v0  ;;  %v2307_v58 = vpack.c.bf16 %v2519_v55, %v2518_v56 }
 0x113   : > { %v2522_v59 = vpop.permute.xlu0 %2521  ;;  %2137 = vmatmul.mubr.msk.f32.vlgmr.msra.gmra.mrb[4].mxu0 %vm289_vm1, %v3054_v10  ;;  %v2527_v60 = vpop.permute.xlu1 %2526 }
 0x114   : > { %2299 = vmatpush3.bf16.msra.mxu1 %v2298_v50  ;;  %v2524_v61 = vunpack.i.h.bf16 %v2522_v59  ;;  %v2523_v62 = vunpack.i.l.bf16 %v2522_v59  ;;  %v2529_v63 = vunpack.i.h.bf16 %v2527_v60  ;;  %v2528_v2 = vunpack.i.l.bf16 %v2527_v60  ;;  %2302 = vmatpush3.bf16.msra.mxu0 %v2301_v57 }
 0x115   : > { %2306 = vmatprep.subr.bf16.mxu1 %v2782_v0  ;;  %2303 = vmatprep.subr.bf16.mxu0 %v2782_v0 }
 0x116   : > { %v2304_v3 = vpack.c.bf16 %v2524_v61, %v2523_v62  ;;  %2158 = vmatprep.mubr.msk.f32.mxu0 %vm2783_vm0, %v2784_v1  ;;  %v2310_v4 = vpack.c.bf16 %v2529_v63, %v2528_v2 }
 0x117   : > { %2148 = vmatmul.mubr.msk.f32.vlgmr.msra.gmra.mrb[4].mxu1 %vm289_vm1, %v3054_v10  ;;  %v2532_v5 = vpop.permute.xlu0 %2531  ;;  %v2537_v6 = vpop.permute.xlu1 %2536 }
 0x118   : > { %2308 = vmatpush3.bf16.msra.mxu1 %v2307_v58  ;;  %2305 = vmatpush3.bf16.msra.mxu0 %v2304_v3  ;;  %v2534_v7 = vunpack.i.h.bf16 %v2532_v5  ;;  %v2533_v8 = vunpack.i.l.bf16 %v2532_v5  ;;  %v2539_v9 = vunpack.i.h.bf16 %v2537_v6  ;;  %v2538_v11 = vunpack.i.l.bf16 %v2537_v6  ;;  %v1384_v3 = vld [vmem:[#allocation8 + $0x8] sm:$0xff]  ;;  %v1383_v6 = vld [vmem:[#allocation8] sm:$0xff] }
 0x119   : > { %2309 = vmatprep.subr.bf16.mxu1 %v2782_v0  ;;  %2169 = vmatprep.mubr.msk.f32.mxu1 %vm2783_vm0, %v2784_v1 }
 0x11a   : > { %v2313_v12 = vpack.c.bf16 %v2534_v7, %v2533_v8  ;;  %2312 = vmatprep.subr.bf16.mxu0 %v2782_v0  ;;  %v2316_v15 = vpack.c.bf16 %v2539_v9, %v2538_v11 }
 0x11b   : > { %2159 = vmatmul.mubr.msk.f32.vlgmr.msra.gmra.mrb[6].mxu0 %vm289_vm1, %v3054_v10  ;;  %v2542_v13 = vpop.permute.xlu0 %2541  ;;  %v2547_v14 = vpop.permute.xlu1 %2546 }
 0x11c   : > { %2311 = vmatpush3.bf16.msra.mxu1 %v2310_v4  ;;  %2314 = vmatpush3.bf16.msra.mxu0 %v2313_v12  ;;  %v2544_v16 = vunpack.i.h.bf16 %v2542_v13  ;;  %v2543_v17 = vunpack.i.l.bf16 %v2542_v13  ;;  %v2549_v19 = vunpack.i.h.bf16 %v2547_v14  ;;  %v2548_v20 = vunpack.i.l.bf16 %v2547_v14  ;;  %v1385_v14 = vld [vmem:[#allocation8 + $0x10] sm:$0xff] }
 0x11d   : > { %2315 = vmatprep.subr.bf16.mxu0 %v2782_v0  ;;  %2180 = vmatprep.mubr.msk.f32.mxu0 %vm2783_vm0, %v2784_v1 }
 0x11e   : > { %2318 = vmatprep.subr.bf16.mxu1 %v2782_v0  ;;  %v2325_v18 = vpack.c.bf16 %v2544_v16, %v2543_v17  ;;  %v2328_v28 = vpack.c.bf16 %v2549_v19, %v2548_v20 }
 0x11f   : > { %2170 = vmatmul.mubr.msk.f32.vlgmr.msra.gmra.mrb[6].mxu1 %vm289_vm1, %v3054_v10  ;;  %v2552_v21 = vpop.permute.xlu0 %2551  ;;  %v2557_v22 = vpop.permute.xlu1 %2556 }
 0x120   : > { %2317 = vmatpush3.bf16.msra.mxu0 %v2316_v15  ;;  %v2554_v23 = vunpack.i.h.bf16 %v2552_v21  ;;  %v2553_v24 = vunpack.i.l.bf16 %v2552_v21  ;;  %v2559_v25 = vunpack.i.h.bf16 %v2557_v22  ;;  %v2558_v26 = vunpack.i.l.bf16 %v2557_v22  ;;  %2191 = vmatprep.mubr.msk.f32.mxu1 %vm2783_vm0, %v2784_v1 }
 0x121   : > { %2324 = vmatprep.subr.bf16.mxu0 %v2782_v0 }
 0x122   : > { %v2319_v27 = vpack.c.bf16 %v2554_v23, %v2553_v24  ;;  %v2322_v29 = vpack.c.bf16 %v2559_v25, %v2558_v26 }
 0x123   : > { %2181 = vmatmul.mubr.msk.f32.vlgmr.msra.gmra.mrb[8].mxu0 %vm289_vm1, %v3054_v10  ;;  %v2562_v30 = vpop.permute.xlu0 %2561  ;;  %v2567_v34 = vpop.permute.xlu1 %2566 }
 0x124   : > { %2326 = vmatpush3.bf16.msra.mxu0 %v2325_v18  ;;  %2320 = vmatpush3.bf16.msra.mxu1 %v2319_v27  ;;  %v2564_v31 = vunpack.i.h.bf16 %v2562_v30  ;;  %v2563_v32 = vunpack.i.l.bf16 %v2562_v30  ;;  %v2569_v35 = vunpack.i.h.bf16 %v2567_v34  ;;  %v2568_v36 = vunpack.i.l.bf16 %v2567_v34  ;;  %v1386_v18 = vld [vmem:[#allocation8 + $0x18] sm:$0xff] }
 0x125   : > { %2327 = vmatprep.subr.bf16.mxu0 %v2782_v0  ;;  %2202 = vmatprep.mubr.msk.f32.mxu0 %vm2783_vm0, %v2784_v1 }
 0x126   : > { %2321 = vmatprep.subr.bf16.mxu1 %v2782_v0  ;;  %v2331_v33 = vpack.c.bf16 %v2564_v31, %v2563_v32  ;;  %v2334_v38 = vpack.c.bf16 %v2569_v35, %v2568_v36 }
 0x128   : > { %2329 = vmatpush3.bf16.msra.mxu0 %v2328_v28  ;;  %2323 = vmatpush3.bf16.msra.mxu1 %v2322_v29 }
 0x129   : > { %2330 = vmatprep.subr.bf16.mxu1 %v2782_v0 }
 0x12b   : > { %2203 = vmatmul.mubr.msk.f32.vlgmr.msra.gmra.mrb[10].mxu0 %vm289_vm1, %v3054_v10  ;;  %2192 = vmatmul.mubr.msk.f32.vlgmr.msra.gmra.mrb[8].mxu1 %vm289_vm1, %v3054_v10 }
 0x12c   : > { %2213 = vmatprep.mubr.msk.f32.mxu1 %vm2783_vm0, %v2784_v1  ;;  %2332 = vmatpush3.bf16.msra.mxu1 %v2331_v33 }
 0x12d   : > { %2333 = vmatprep.subr.bf16.mxu1 %v2782_v0 }
 0x130   : > { %2335 = vmatpush3.bf16.msra.mxu1 %v2334_v38 }
 0x133   : > { %2214 = vmatmul.mubr.msk.f32.vlgmr.msra.gmra.mrb[10].mxu1 %vm289_vm1, %v3054_v10 }
 0x165   : > { %v359_v37 = vpop.f32.mrb[0].mxu0 }
 0x166   : > { %v2094_v39 = vpop.f32.mrb[1].mxu0  ;;  %2224 = vmatprep.mubr.msk.f32.mxu0 %vm1269_vm2, %v359_v37 }
 0x1da   : > { %v445_v40 = vpop.f32.mrb[0].mxu1 }
 0x1db   : > { %v2105_v41 = vpop.f32.mrb[1].mxu1 }
 0x1de   : > { %v527_v42 = vpop.f32.mrb[2].mxu0 }
 0x1df   : > { %v2116_v43 = vpop.f32.mrb[3].mxu0 }
 0x1e2   : > { %v609_v44 = vpop.f32.mrb[2].mxu1 }
 0x1e3   : > { %v2127_v45 = vpop.f32.mrb[3].mxu1 }
 0x1e6   : > { %v691_v0 = vpop.f32.mrb[4].mxu0 }
 0x1e7   : > { %v2138_v46 = vpop.f32.mrb[5].mxu0 }
 0x1ea   : > { %v773_v47 = vpop.f32.mrb[4].mxu1 }
 0x1eb   : > { %v2336_v48 = vpack.c.bf16 %v773_v47, %v691_v0  ;;  %v2149_v49 = vpop.f32.mrb[5].mxu1 }
 0x1ed   : > { %2338 = vmatprep.subr.msk.bf16.mxu0 %vm2337_vm3, %v2336_v48 }
 0x1ee   : > { %2341 = vmatpush3.bf16.xpose.msk.msra.mxu0 %vm2337_vm3, %v2336_v48  ;;  %v855_v50 = vpop.f32.mrb[6].mxu0 }
 0x1ef   : > { %v2160_v51 = vpop.f32.mrb[7].mxu0 }
 0x1f2   : > { %v937_v52 = vpop.f32.mrb[6].mxu1 }
 0x1f3   : > { %v2342_v10 = vpack.c.bf16 %v937_v52, %v855_v50  ;;  %v2171_v53 = vpop.f32.mrb[7].mxu1 }
 0x1f4   : > { %v1533_v53 = vld [vmem:[#allocation7] sm:$0xff] }
 0x1f5   : > { %2344 = vmatprep.subr.msk.bf16.mxu0 %vm2337_vm3, %v2342_v10 }
 0x1f6   : > { %2347 = vmatpush3.bf16.xpose.msk.msra.mxu0 %vm2337_vm3, %v2342_v10  ;;  %v1019_v54 = vpop.f32.mrb[8].mxu0 }
 0x1f7   : > { %v2182_v55 = vpop.f32.mrb[9].mxu0 }
 0x1f8   : > { %v1614_v55 = vld [vmem:[#allocation7 + $0x8] sm:$0xff] }
 0x1fd   : > { %2225 = vmatmul.mubr.msk.f32.vlgmr.msra.gmra.mrb[12].mxu0 %vm1269_vm2, %v445_v40 }
 0x1fe   : > { %2227 = vmatprep.mubr.msk.f32.mxu0 %vm1269_vm2, %v527_v42  ;;  %v1101_v56 = vpop.f32.mrb[8].mxu1  ;;  %v1183_v57 = vpop.f32.mrb[10].mxu0 }
 0x1ff   : > { %v2348_v58 = vpack.c.bf16 %v1101_v56, %v1019_v54  ;;  %v2193_v59 = vpop.f32.mrb[9].mxu1  ;;  %v2204_v60 = vpop.f32.mrb[11].mxu0 }
 0x200   : > { %v1689_v59 = vld [vmem:[#allocation7 + $0x10] sm:$0xff]  ;;  %v1764_v60 = vld [vmem:[#allocation7 + $0x18] sm:$0xff] }
 0x201   : > { %2228 = vmatmul.mubr.msk.f32.gmra.mrb[14].mxu0 %vm1269_vm2, %v609_v44  ;;  %2349 = vmatprep.subr.bf16.mxu0 %v2348_v58 }
 0x202   : > { %2356 = vmatprep.subr.bf16.mxu1 %v2348_v58  ;;  %2351 = vmatpush3.bf16.msra.mxu0 %v2348_v58 }
 0x203   : > { %2358 = vmatpush3.bf16.msra.mxu1 %v2348_v58 }
 0x206   : > { %v1265_v61 = vpop.f32.mrb[10].mxu1 }
 0x207   : > { %v2352_v62 = vpack.c.bf16 %v1265_v61, %v1183_v57  ;;  %v2215_v63 = vpop.f32.mrb[11].mxu1  ;;  %v1992_v61 = vld [vmem:[%s3212_s3] ss:$0 sm:$0xff] }
 0x209   : > { %2353 = vmatprep.subr.bf16.mxu0 %v2352_v62  ;;  %2357 = vmatprep.subr.bf16.mxu1 %v2352_v62 }
 0x20a   : > { %2355 = vmatpush3.bf16.msra.mxu0 %v2352_v62  ;;  %2359 = vmatpush3.bf16.msra.mxu1 %v2352_v62 }
 0x20b   : > { %2244 = vmatprep.subr.mxu1 %v2784_v1 }
 0x2d0   : > { %v2226_v2 = vpop.f32.mrb[12].mxu0 }
 0x2d1   : > { %v1380_v4 = vmul.f32 0.35355338, %v2226_v2  ;;  %v1360_v5 = vpop.f32.mrb[13].mxu0 }
 0x2d2   : > { %v1379_v7 = vmul.f32 0.35355338, %v1360_v5 }
 0x2d3   : > { %v1388_v8 = vadd.f32 %v1384_v3, %v1380_v4 }
 0x2d4   : > { %v2229_v9 = vpop.f32.mrb[14].mxu0  ;;  %v1387_v11 = vadd.f32 %v1383_v6, %v1379_v7 }
 0x2d5   : > { %v1370_v12 = vpop.f32.mrb[15].mxu0  ;;  %v1394_v13 = vsel %vm289_vm1, %v1388_v8, -inf  ;;  %v1382_v15 = vmul.f32 0.35355338, %v2229_v9 }
 0x2d6   : > { %v1381_v16 = vmul.f32 0.35355338, %v1370_v12  ;;  %1395 = vmax.xlane.f32.xlu1 %v1394_v13  ;;  %v1391_v17 = vsel %vm289_vm1, %v1387_v11, -inf }
 0x2d7   : > { %1392 = vmax.xlane.f32.xlu0 %v1391_v17  ;;  %v1390_v21 = vadd.f32 %v1386_v18, %v1382_v15 }
 0x2d8   : > { %v1389_v19 = vadd.f32 %v1385_v14, %v1381_v16 }
 0x2d9   : > { %v1400_v22 = vsel %vm289_vm1, %v1390_v21, -inf }
 0x2da   : > { %v1397_v20 = vsel %vm289_vm1, %v1389_v19, -inf }
 0x2db   : > { %1398 = vmax.xlane.f32.xlu0 %v1397_v20 }
 0x2df   : > { %1401 = vmax.xlane.f32.xlu0 %v1400_v22 }
 0x363   : > { %v1396_v23 = vpop.xlane.xlu1 %1395 }
 0x364   : > { %v1404_v24 = vsub.f32 %v1388_v8, %v1396_v23  ;;  %v1393_v25 = vpop.xlane.xlu0 %1392 }
 0x365   : > { %v1403_v26 = vsub.f32 %v1387_v11, %v1393_v25 }
 0x366   : > { %v1409_v27 = vmul.f32 1.442695, %v1404_v24 }
 0x367   : > { %v1407_v28 = vmul.f32 1.442695, %v1403_v26 }
 0x368   : > { %2570 = vpow2.f32 %v1409_v27  ;;  %v1399_v29 = vpop.xlane.xlu0 %1398 }
 0x369   : > { %2572 = vpow2.f32 %v1407_v28  ;;  %v1405_v30 = vsub.f32 %v1389_v19, %v1399_v29 }
 0x36b   : > { %v1411_v31 = vmul.f32 1.442695, %v1405_v30 }
 0x36c   : > { %v1402_v32 = vpop.xlane.xlu0 %1401 }
 0x36d   : > { %2574 = vpow2.f32 %v1411_v31  ;;  %v1406_v33 = vsub.f32 %v1390_v21, %v1402_v32 }
 0x36f   : > { %v1413_v34 = vmul.f32 1.442695, %v1406_v33 }
 0x371   : > { %2576 = vpow2.f32 %v1413_v34 }
 0x372   : > { %v2571_v35 = vpop.eup %2570 }
 0x373   : > { %v2573_v36 = vpop.eup %2572  ;;  %v1418_v37 = vsel %vm289_vm1, %v2571_v35, 0.0 }
 0x374   : > { %1419 = vadd.xlane.f32.xlu0 %v1418_v37  ;;  %v1415_v38 = vsel %vm289_vm1, %v2573_v36, 0.0 }
 0x375   : > { %1416 = vadd.xlane.f32.xlu1 %v1415_v38 }
 0x377   : > { %v2575_v39 = vpop.eup %2574 }
 0x378   : > { %v1421_v40 = vsel %vm289_vm1, %v2575_v39, 0.0 }
 0x379   : > { %1422 = vadd.xlane.f32.xlu1 %v1421_v40 }
 0x37b   : > { %v2577_v41 = vpop.eup %2576 }
 0x37c   : > { %v1424_v42 = vsel %vm289_vm1, %v2577_v41, 0.0 }
 0x37d   : > { %1425 = vadd.xlane.f32.xlu0 %v1424_v42 }
 0x401   : > { %v1420_v43 = vpop.xlane.xlu0 %1419 }
 0x402   : > { %2578 = vrcp.f32 %v1420_v43  ;;  %v1417_v44 = vpop.xlane.xlu1 %1416 }
 0x403   : > { %2580 = vrcp.f32 %v1417_v44 }
 0x406   : > { %v1423_v45 = vpop.xlane.xlu1 %1422 }
 0x407   : > { %2582 = vrcp.f32 %v1423_v45 }
 0x40a   : > { %v1426_v0 = vpop.xlane.xlu0 %1425 }
 0x40b   : > { %2584 = vrcp.f32 %v1426_v0 }
 0x40c   : > { %v2579_v46 = vpop.eup %2578 }
 0x40d   : > { %v2581_v47 = vpop.eup %2580  ;;  %v1432_v49 = vmul.f32 %v2579_v46, %v2571_v35 }
 0x40e   : > { %v1431_v48 = vmul.f32 %v2581_v47, %v2573_v36 }
 0x410   : > { %2238 = vmatprep.mubr.msk.f32.mxu0 %vm289_vm1, %v1431_v48 }
 0x411   : > { %v2583_v50 = vpop.eup %2582  ;;  %2239 = vmatmul.mubr.msk.f32.vlgmr.msra.gmra.mrb[16].mxu0 %vm289_vm1, %v1432_v49 }
 0x412   : > { %v1433_v51 = vmul.f32 %v2583_v50, %v2575_v39 }
 0x414   : > { %2241 = vmatprep.mubr.msk.f32.mxu1 %vm289_vm1, %v1433_v51 }
 0x415   : > { %v2585_v52 = vpop.eup %2584 }
 0x416   : > { %v1434_v10 = vmul.f32 %v2585_v52, %v2577_v41 }
 0x418   : > { %2242 = vmatmul.mubr.msk.f32.vlgmr.msra.gmra.mrb[12].mxu1 %vm289_vm1, %v1434_v10 }
 0x419   : > { %2245 = vmatpush3.msra.mxu1 %v1533_v53  ;;  %2246 = vmatprep.mubr.msk.f32.mxu1 %vm2783_vm0, %v2784_v1 }
 0x41a   : > { %2249 = vmatprep.subr.mxu1 %v2784_v1 }
 0x4e4   : > { %v2240_v54 = vpop.f32.mrb[16].mxu0 }
 0x4e5   : > { %v1513_v56 = vpop.f32.mrb[17].mxu0 }
 0x4e6   : > { %2247 = vmatmul.mubr.msk.f32.vlgmr.msra.gmra.mrb[14].mxu1 %vm1269_vm2, %v1513_v56 }
 0x4e7   : > { %2250 = vmatpush3.msra.mxu1 %v1614_v55  ;;  %2251 = vmatprep.mubr.msk.f32.mxu1 %vm2783_vm0, %v2784_v1 }
 0x4e8   : > { %2254 = vmatprep.subr.mxu1 %v2784_v1 }
 0x4eb   : > { %v2243_v57 = vpop.f32.mrb[12].mxu1 }
 0x4ec   : > { %v1523_v58 = vpop.f32.mrb[13].mxu1 }
 0x4ee   : > { %2252 = vmatmul.mubr.msk.f32.vlgmr.msra.gmra.mrb[14].mxu1 %vm1269_vm2, %v2240_v54 }
 0x4ef   : > { %2255 = vmatpush3.msra.mxu1 %v1689_v59  ;;  %2256 = vmatprep.mubr.msk.f32.mxu1 %vm2783_vm0, %v2784_v1 }
 0x4f0   : > { %2259 = vmatprep.subr.mxu1 %v2784_v1 }
 0x4f6   : > { %2257 = vmatmul.mubr.msk.f32.vlgmr.msra.gmra.mrb[14].mxu1 %vm1269_vm2, %v1523_v58 }
 0x4f7   : > { %2260 = vmatpush3.msra.mxu1 %v1764_v60  ;;  %2261 = vmatprep.mubr.msk.f32.mxu1 %vm2783_vm0, %v2784_v1 }
 0x4fe   : > { %2262 = vmatmul.mubr.msk.f32.vlgmr.msra.gmra.mrb[14].mxu1 %vm1269_vm2, %v2243_v57 }
 0x5d1   : > { %v1834_v62 = vpop.f32.mrb[14].mxu1 }
 0x5d2   : > { %v2360_v63 = vadd.f32 %v1992_v61, %v1834_v62  ;;  %v2263_v2 = vpop.f32.mrb[15].mxu1 }
 0x5d4   : > { %1839 = vst.msk [vmem:[%s283_s24] sm:$0xff] %vm289_vm1, %v2360_v63 }
 0x5d5   : > { %2713 = shalt.err (!%p2710_p4)
}
 0x5d6   : > { %s2714_s6 = scalar_lea.hbm %s3164_s15, 128  ;;  %s2718_s27 = scalar_lea.hbm %s3214_s5, 256 }
 0x5d7   : > { %p2715_p0 = scmp.ne.s32.totalorder %s3164_s15, %s2714_s6  ;;  %p2719_p8 = scmp.lt.u32.totalorder %s3164_s15, %s3214_s5 }
 0x5d8   : > { %p2720_p13 = scmp.lt.u32.totalorder %s2718_s27, %s2714_s6  ;;  %p2722_p10 = scmp.lt.u32.totalorder %s2714_s6, %s3164_s15 }
 0x5d9   : > { %p2716_p9 = pnand %p2715_p0, %p2981_p5 }
 0x5da   : > { %p2721_p6 = por %p2720_p13, %p2719_p8 }
 0x5db   : > { %p2717_p11 = pneg %p2716_p9 }
 0x5dc   : > { %p2723_p3 = por %p2722_p10, %p2721_p6 }
 0x5de   : > { %p2724_p7 = pnand %p2723_p3, %p2717_p11 }
 0x5e0   : > { %2727 = shalt.err (!%p2724_p7)
}
 0x5e1   : > { %2381 = dma.vmem_to_hbm [thread:$0]  (%p2981_p5), %s3166_s26, 128, %s3164_s15, %s1841_s16  }
 0x5e2 PF: > { %s1866_s17 = sand.u32 1, %s2762_s18   ;;  %p3232_p12 = scmp.ne.s32.totalorder %s3219_s25, 0 }
 0x5e3   : > { %p3233_p1 = scmp.ge.s32.totalorder %s2774_s21, 2  ;;  %s1867_s24 = scalar_lea.sflag [#allocation4], %s1866_s17 }
 0x5e5   : > { %p2398_p2 = pnand %p3233_p1, %p3232_p12 }
 0x5e7   : > { %2757 = dma.done.wait (!%p2398_p2), %s1867_s24, 128  }
 0x5e8   : > { %2759 = vsyncadd (!%p2398_p2), %s1867_s24, 4294967168  ;;  %p20_p4 = scmp.ge.s32.totalorder %s2967_s14, 4   ;;  %s3234_s18 = smov %s2766_s19 }
 0x5e9   : > { %s3235_s19 = smov %s2770_s20  ;;  %s3236_s20 = smov %s2977_s30 }
 0x5ea   : > { %s3237_s21 = smov %s2967_s14  ;;  %22 = sbr.rel (!%p20_p4) target bundleno = 7 (0x7), region = 97 }
 0x5f1   :  { %1872 = vsyncpa [#allocation3], 1 }
 0x5f2   :  { %1874 = vsyncpa [#allocation3 + $0x1], 1 }
 0x5f3   :  { %1875 = vsyncpa [#allocation6], 1 }
 0x5f4   :  { %1876 = vsyncpa [#allocation9], 1 }
 0x5f5   :  { %1877 = vsyncpa [#allocation4], 1 }
 0x5f6   :  { %1879 = vsyncpa [#allocation4 + $0x1], 1 }

</bundles_post_ra>
